<compile_context>
chip_gen: v7x
topology: tpu7x:2x2x1
jax: 0.10.0
libtpu: 0.0.40
codegen_flags: <defaults>
</compile_context>

<pallas_src>
import functools

import jax
import jax.numpy as jnp
from jax.experimental import pallas as pl
from jax.experimental.pallas import tpu as pltpu


def _round_up(x: int, m: int) -> int:
    return ((x + m - 1) // m) * m


def _w2v_tile_kernel(tb, tgt_ids_ref, ctx_ids_ref, emb_hbm, out_ref,
                     tgt_buf, ctx_buf, sem):
    # tgt_ids_ref, ctx_ids_ref : [B_pad] int32 in SMEM (scalar prefetch).
    # emb_hbm                  : [V, Dpad] f32 ref left in HBM (pl.ANY).
    # out_ref                  : [tb, 1] f32 VMEM block (packed score column).
    # tgt_buf, ctx_buf         : [tb, Dpad] f32 VMEM scratch (gather targets).
    # sem                      : DMA semaphores, shape (2,) (tgt / ctx streams).
    tile = pl.program_id(0)
    base = tile * tb

    # Issue all 2*tb row gathers for this tile; they all fly concurrently,
    # so DMA latency is pipelined across the whole tile.
    @pl.loop(0, tb)
    def _issue(j):
        t_id = tgt_ids_ref[base + j]
        c_id = ctx_ids_ref[base + j]
        pltpu.make_async_copy(
            emb_hbm.at[pl.ds(t_id, 1)], tgt_buf.at[pl.ds(j, 1)], sem.at[0]
        ).start()
        pltpu.make_async_copy(
            emb_hbm.at[pl.ds(c_id, 1)], ctx_buf.at[pl.ds(j, 1)], sem.at[1]
        ).start()

    # Drain: wait for every copy.  Same-shape descriptors reconstruct the
    # per-copy completion count (standard paged-attention wait pattern).
    @pl.loop(0, tb)
    def _drain(j):
        pltpu.make_async_copy(
            emb_hbm.at[pl.ds(0, 1)], tgt_buf.at[pl.ds(j, 1)], sem.at[0]
        ).wait()
        pltpu.make_async_copy(
            emb_hbm.at[pl.ds(0, 1)], ctx_buf.at[pl.ds(j, 1)], sem.at[1]
        ).wait()

    # One vectorized multiply + lane reduction for the whole tile (VPU + XLU).
    prod = tgt_buf[...] * ctx_buf[...]                       # (tb, Dpad)
    out_ref[...] = jnp.sum(prod, axis=-1, keepdims=True)     # (tb, 1)


def word2vec_forward(embedding_table, target_word, context_word, *, block_b=512):
    """embedding_table: [V, D] f32; target_word/context_word: [B] int.

    Returns [B] f32 score, matching the PyTorch module's forward().
    """
    V, D = embedding_table.shape
    B = target_word.shape[0]

    # Lane-pad the embedding dim once (zeros do not change the dot product).
    d_pad = _round_up(D, 128)
    emb = embedding_table.astype(jnp.float32)
    if d_pad != D:
        emb = jnp.pad(emb, ((0, 0), (0, d_pad - D)))

    # Batch tile: multiple of 128 (lane/sublane friendly), capped at block_b.
    tb = min(_round_up(block_b, 128), _round_up(B, 128))
    n_tiles = pl.cdiv(B, tb)
    b_pad = n_tiles * tb

    # Pad index vectors with 0 (a valid row); padded scores are sliced off.
    tgt = jnp.zeros((b_pad,), jnp.int32).at[:B].set(target_word.astype(jnp.int32))
    ctx = jnp.zeros((b_pad,), jnp.int32).at[:B].set(context_word.astype(jnp.int32))

    grid_spec = pltpu.PrefetchScalarGridSpec(
        num_scalar_prefetch=2,                  # tgt, ctx ids land in SMEM
        grid=(n_tiles,),
        in_specs=[
            pl.BlockSpec(memory_space=pl.ANY),  # table stays in HBM; manual DMA
        ],
        out_specs=pl.BlockSpec((tb, 1), lambda i, tgt_r, ctx_r: (i, 0)),
        scratch_shapes=[
            pltpu.VMEM((tb, d_pad), jnp.float32),   # gathered target rows
            pltpu.VMEM((tb, d_pad), jnp.float32),   # gathered context rows
            pltpu.SemaphoreType.DMA((2,)),
        ],
    )

    out = pl.pallas_call(
        functools.partial(_w2v_tile_kernel, tb),
        out_shape=jax.ShapeDtypeStruct((b_pad, 1), jnp.float32),
        grid_spec=grid_spec,
        compiler_params=pltpu.CompilerParams(
            dimension_semantics=("parallel",),  # independent tiles -> v7x megacore
        ),
    )(tgt, ctx, emb)

    return out.reshape(-1)[:B]


if __name__ == "__main__":
    vocab_size = 16
    embedding_dim = 32
    batch = 8

    key = jax.random.PRNGKey(0)
    k_emb, k_tgt, k_ctx = jax.random.split(key, 3)

    # Deterministic "nn.Embedding" weight init (N(0,1), like torch default).
    embedding_table = jax.random.normal(
        k_emb, (vocab_size, embedding_dim), dtype=jnp.float32)

    target_word = jax.random.randint(k_tgt, (batch,), 0, vocab_size, dtype=jnp.int32)
    context_word = jax.random.randint(k_ctx, (batch,), 0, vocab_size, dtype=jnp.int32)

    score = jax.block_until_ready(
        word2vec_forward(embedding_table, target_word, context_word))

    # Pure-JAX reference for correctness.
    ref = jnp.sum(embedding_table[target_word] * embedding_table[context_word], axis=1)
    assert score.shape == (batch,)
    assert jnp.allclose(score, ref, atol=1e-5, rtol=1e-5), (score, ref)

    print("KERNEL_OK")
</pallas_src>

<mosaic_0001>
module attributes {stable_mosaic.version = 11 : i64} {
  func.func @_w2v_tile_kernel(%arg0: i32, %arg1: memref<128xi32, #tpu.memory_space<smem>>, %arg2: memref<128xi32, #tpu.memory_space<smem>>, %arg3: memref<16x128xf32, #tpu.memory_space<any>>, %arg4: memref<128x1xf32, #tpu.memory_space<vmem>>, %arg5: memref<128x128xf32, #tpu.memory_space<vmem>>, %arg6: memref<128x128xf32, #tpu.memory_space<vmem>>, %arg7: memref<2x!tpu.dma_semaphore, #tpu.memory_space<semaphore_mem>>) attributes {dimension_semantics = [#tpu.dimension_semantics<parallel>], iteration_bounds = array<i64: 1>, scalar_prefetch = 2 : i64, scratch_operands = 3 : i64, tpu.core_type = #tpu.core_type<tc>, window_params = [{}, {transform_indices = @transform_1, window_bounds = array<i64: 128, 1>}]} {
    %c128_i32 = arith.constant 128 : i32
    %0 = arith.muli %arg0, %c128_i32 : i32
    %c0_i32 = arith.constant 0 : i32
    %c128_i32_0 = arith.constant 128 : i32
    %1 = arith.addi %c0_i32, %c128_i32_0 : i32
    %c1_i32 = arith.constant 1 : i32
    scf.for %arg8 = %c0_i32 to %1 step %c1_i32  : i32 {
      %c1_i32_11 = arith.constant 1 : i32
      %9 = arith.muli %arg8, %c1_i32_11 : i32
      %c0_i32_12 = arith.constant 0 : i32
      %10 = arith.addi %c0_i32_12, %9 : i32
      %11 = arith.addi %0, %10 : i32
      %12 = arith.index_cast %11 : i32 to index
      %13 = memref.load %arg1[%12] : memref<128xi32, #tpu.memory_space<smem>>
      %14 = arith.addi %0, %10 : i32
      %15 = arith.index_cast %14 : i32 to index
      %16 = memref.load %arg2[%15] : memref<128xi32, #tpu.memory_space<smem>>
      %c0_i32_13 = arith.constant 0 : i32
      %c0_i32_14 = arith.constant 0 : i32
      %17 = tpu.memref_slice %arg3[%13, %c0_i32_14] : memref<16x128xf32, #tpu.memory_space<any>> -> memref<1x128xf32, #tpu.memory_space<any>>
      %c0_i32_15 = arith.constant 0 : i32
      %18 = tpu.memref_slice %arg5[%10, %c0_i32_15] : memref<128x128xf32, #tpu.memory_space<vmem>> -> memref<1x128xf32, #tpu.memory_space<vmem>>
      %19 = tpu.memref_slice %arg7[%c0_i32_13] : memref<2x!tpu.dma_semaphore, #tpu.memory_space<semaphore_mem>> -> memref<1x!tpu.dma_semaphore, #tpu.memory_space<semaphore_mem>>
      %20 = tpu.memref_squeeze %19 : memref<1x!tpu.dma_semaphore, #tpu.memory_space<semaphore_mem>> -> memref<!tpu.dma_semaphore, #tpu.memory_space<semaphore_mem>>
      tpu.enqueue_dma source(%17 : memref<1x128xf32, #tpu.memory_space<any>>) target(%18 : memref<1x128xf32, #tpu.memory_space<vmem>>) target_semaphore(%20 : memref<!tpu.dma_semaphore, #tpu.memory_space<semaphore_mem>>)
      %c1_i32_16 = arith.constant 1 : i32
      %c0_i32_17 = arith.constant 0 : i32
      %21 = tpu.memref_slice %arg3[%16, %c0_i32_17] : memref<16x128xf32, #tpu.memory_space<any>> -> memref<1x128xf32, #tpu.memory_space<any>>
      %c0_i32_18 = arith.constant 0 : i32
      %22 = tpu.memref_slice %arg6[%10, %c0_i32_18] : memref<128x128xf32, #tpu.memory_space<vmem>> -> memref<1x128xf32, #tpu.memory_space<vmem>>
      %23 = tpu.memref_slice %arg7[%c1_i32_16] : memref<2x!tpu.dma_semaphore, #tpu.memory_space<semaphore_mem>> -> memref<1x!tpu.dma_semaphore, #tpu.memory_space<semaphore_mem>>
      %24 = tpu.memref_squeeze %23 : memref<1x!tpu.dma_semaphore, #tpu.memory_space<semaphore_mem>> -> memref<!tpu.dma_semaphore, #tpu.memory_space<semaphore_mem>>
      tpu.enqueue_dma source(%21 : memref<1x128xf32, #tpu.memory_space<any>>) target(%22 : memref<1x128xf32, #tpu.memory_space<vmem>>) target_semaphore(%24 : memref<!tpu.dma_semaphore, #tpu.memory_space<semaphore_mem>>)
    }
    %c128_i32_1 = arith.constant 128 : i32
    %c0_i32_2 = arith.constant 0 : i32
    %c128_i32_3 = arith.constant 128 : i32
    %2 = arith.addi %c0_i32_2, %c128_i32_3 : i32
    %c1_i32_4 = arith.constant 1 : i32
    scf.for %arg8 = %c0_i32_2 to %2 step %c1_i32_4  : i32 {
      %c1_i32_11 = arith.constant 1 : i32
      %9 = arith.muli %arg8, %c1_i32_11 : i32
      %c0_i32_12 = arith.constant 0 : i32
      %10 = arith.addi %c0_i32_12, %9 : i32
      %c0_i32_13 = arith.constant 0 : i32
      %c0_i32_14 = arith.constant 0 : i32
      %c0_i32_15 = arith.constant 0 : i32
      %11 = tpu.memref_slice %arg3[%c0_i32_14, %c0_i32_15] : memref<16x128xf32, #tpu.memory_space<any>> -> memref<1x128xf32, #tpu.memory_space<any>>
      %c0_i32_16 = arith.constant 0 : i32
      %12 = tpu.memref_slice %arg5[%10, %c0_i32_16] : memref<128x128xf32, #tpu.memory_space<vmem>> -> memref<1x128xf32, #tpu.memory_space<vmem>>
      %13 = tpu.memref_slice %arg7[%c0_i32_13] : memref<2x!tpu.dma_semaphore, #tpu.memory_space<semaphore_mem>> -> memref<1x!tpu.dma_semaphore, #tpu.memory_space<semaphore_mem>>
      %14 = tpu.memref_squeeze %13 : memref<1x!tpu.dma_semaphore, #tpu.memory_space<semaphore_mem>> -> memref<!tpu.dma_semaphore, #tpu.memory_space<semaphore_mem>>
      tpu.wait_dma2 semaphore(%14 : memref<!tpu.dma_semaphore, #tpu.memory_space<semaphore_mem>>) src(%11 : memref<1x128xf32, #tpu.memory_space<any>>) dst(%12 : memref<1x128xf32, #tpu.memory_space<vmem>>)
      %c1_i32_17 = arith.constant 1 : i32
      %c0_i32_18 = arith.constant 0 : i32
      %c0_i32_19 = arith.constant 0 : i32
      %15 = tpu.memref_slice %arg3[%c0_i32_18, %c0_i32_19] : memref<16x128xf32, #tpu.memory_space<any>> -> memref<1x128xf32, #tpu.memory_space<any>>
      %c0_i32_20 = arith.constant 0 : i32
      %16 = tpu.memref_slice %arg6[%10, %c0_i32_20] : memref<128x128xf32, #tpu.memory_space<vmem>> -> memref<1x128xf32, #tpu.memory_space<vmem>>
      %17 = tpu.memref_slice %arg7[%c1_i32_17] : memref<2x!tpu.dma_semaphore, #tpu.memory_space<semaphore_mem>> -> memref<1x!tpu.dma_semaphore, #tpu.memory_space<semaphore_mem>>
      %18 = tpu.memref_squeeze %17 : memref<1x!tpu.dma_semaphore, #tpu.memory_space<semaphore_mem>> -> memref<!tpu.dma_semaphore, #tpu.memory_space<semaphore_mem>>
      tpu.wait_dma2 semaphore(%18 : memref<!tpu.dma_semaphore, #tpu.memory_space<semaphore_mem>>) src(%15 : memref<1x128xf32, #tpu.memory_space<any>>) dst(%16 : memref<1x128xf32, #tpu.memory_space<vmem>>)
    }
    %c128_i32_5 = arith.constant 128 : i32
    %c0 = arith.constant 0 : index
    %c0_6 = arith.constant 0 : index
    %3 = vector.load %arg5[%c0, %c0_6] : memref<128x128xf32, #tpu.memory_space<vmem>>, vector<128x128xf32>
    %c0_7 = arith.constant 0 : index
    %c0_8 = arith.constant 0 : index
    %4 = vector.load %arg6[%c0_7, %c0_8] : memref<128x128xf32, #tpu.memory_space<vmem>>, vector<128x128xf32>
    %5 = arith.mulf %3, %4 : vector<128x128xf32>
    %cst = arith.constant dense<0.000000e+00> : vector<128xf32>
    %6 = vector.multi_reduction <add>, %5, %cst [1] : vector<128x128xf32> to vector<128xf32>
    %7 = vector.shape_cast %6 : vector<128xf32> to vector<128x1xf32>
    %c0_9 = arith.constant 0 : index
    %c0_10 = arith.constant 0 : index
    %8 = vector.load %arg4[%c0_9, %c0_10] : memref<128x1xf32, #tpu.memory_space<vmem>>, vector<128x1xf32>
    tpu.vector_store %arg4[%c0_9, %c0_10], %7 {strides = array<i32>} : memref<128x1xf32, #tpu.memory_space<vmem>>, vector<128x1xf32>,
    return
  }
  func.func @transform_1(%arg0: i32, %arg1: memref<128xi32, #tpu.memory_space<smem>>, %arg2: memref<128xi32, #tpu.memory_space<smem>>) -> (i32, i32) {
    %c0_i32 = arith.constant 0 : i32
    %c0_i32_0 = arith.constant 0 : i32
    return %arg0, %c0_i32 : i32, i32
  }
}

</mosaic_0001>

<bundles_post_ra>
// kernel: tpu_custom_call.1
= control target key start
LH: loop header
LB: loop body
LE: loop exit
PB: predicated region body
PF: predicated region fallthrough
CT: control target
= control target key end

     0   :  { %s450_s0 = inlined_call_operand.hbm [shape: s32[128], index: 0, kind: input, shape index: {}]   ;;  %s451_s2 = inlined_call_operand.hbm [shape: f32[16,128], index: 2, kind: input, shape index: {}]   ;;  %s452_s3 = inlined_call_operand.vmem [shape: f32[128,1], index: 3, kind: output, shape index: {}]   ;;  %s453_s1 = inlined_call_operand.vmem [shape: s32[128], index: 1, kind: input, shape index: {}]  }
   0x1   :  { %s219_s14 = scalar_lea.hbm %s450_s0, 16 }
   0x2   :  { %p220_p0 = scmp.ne.s32.totalorder %s450_s0, %s219_s14  ;;  %p223_p1 = scmp.lt.u32.totalorder %s219_s14, %s450_s0 }
   0x4   :  { %p225_p2 = pnand %p223_p1, %p220_p0 }
   0x6   :  { %228 = shalt.err (!%p225_p2)  }
   0x7   :  { %s311_s19 = smov [#allocation6]   ;;  %s10_s24 = sshll.u32 %s453_s1, 4  ;;  %s11_s24 = int_to_ptr.vmem [resolvable:$true] %s10_s24 }
   0x8   :  { %9 = dma.hbm_to_smem %s450_s0, 16, %s311_s19, [#allocation5] }
   0x9   :  { %s229_s25 = scalar_lea.vmem %s11_s24, 16  ;;  %p234_p4 = scmp.lt.s32.totalorder %s11_s24, %s11_s24 }
   0xa   :  { %p230_p3 = scmp.ne.s32.totalorder %s11_s24, %s229_s25  ;;  %p235_p5 = scmp.lt.s32.totalorder %s229_s25, %s229_s25 }
   0xc   :  { %p236_p6 = por %p235_p5, %p234_p4 }
   0xe   :  { %p237_p7 = pnand %p236_p6, %p230_p3 }
  0x10   :  { %240 = shalt.err (!%p237_p7)  }
  0x11   :  { %s312_s26 = smov [#allocation7]  }
  0x12   :  { %13 = dma.vmem_to_smem %s11_s24, 16, %s312_s26, [#allocation5] }
  0x13   :  { %297 = dma.done.wait [#allocation5], 32 }
  0x14   :  { %298 = vsyncadd [#allocation5], 4294967264 }
  0x15   :  { %15 = sfence }
  0x16   :  { %s350_s27 = smov 0  }
  0x17 LB: > { %s24_s0 = sld [smem:[#allocation6 + %s305_s27]]  ;;  %s28_s28 = scalar_lea.vmem [#allocation2], %s305_s27  ;;  %s305_s27 = sphi %s350_s27, %s22_s27  }
  0x18   : > { %s357_s1 = sld [smem:[#allocation7 + %s305_s27]]  ;;  %s36_s29 = sshll.u32 %s28_s28, 4  ;;  %s37_s29 = int_to_ptr.vmem [resolvable:$true] %s36_s29 }
  0x19   : > { %s42_s30 = scalar_lea.vmem [#allocation3], %s305_s27  ;;  %s243_s13 = scalar_lea.hbm %s451_s2, 256 }
  0x1a   : > { %s51_s4 = sshll.u32 %s42_s30, 4  ;;  %s361_s4 = int_to_ptr.vmem [resolvable:$true] %s51_s4 }
  0x1d   : > { %s197_s5 = sshll.u32 %s24_s0, 4 }
  0x1e   : > { %s27_s8 = scalar_lea.hbm %s451_s2, %s197_s5  ;;  %s198_s9 = sshll.u32 %s357_s1, 4 }
  0x1f   : > { %s241_s10 = scalar_lea.hbm %s27_s8, 16  ;;  %p244_p9 = scmp.lt.u32.totalorder %s27_s8, %s451_s2 }
  0x20   : > { %p242_p8 = scmp.ne.s32.totalorder %s27_s8, %s241_s10  ;;  %p245_p10 = scmp.lt.u32.totalorder %s243_s13, %s241_s10 }
  0x21   : > { %p247_p12 = scmp.lt.u32.totalorder %s241_s10, %s27_s8 }
  0x22   : > { %p246_p11 = por %p245_p10, %p244_p9 }
  0x24   : > { %p248_p13 = por %p247_p12, %p246_p11 }
  0x26   : > { %p249_p0 = pnand %p248_p13, %p242_p8 }
  0x28   : > { %252 = shalt.err (!%p249_p0)  }
  0x29   : > { %s253_s16 = scalar_lea.vmem %s37_s29, 16  ;;  %s313_s17 = smov [#allocation2]  }
  0x2a   : > { %p254_p1 = scmp.ne.s32.totalorder %s37_s29, %s253_s16  ;;  %s255_s18 = sshll.u32 %s313_s17, 4  ;;  %s256_s18 = int_to_ptr.vmem [resolvable:$false] %s255_s18 }
  0x2b   : > { %s257_s19 = scalar_lea.vmem %s256_s18, 2048  ;;  %p258_p2 = scmp.lt.s32.totalorder %s37_s29, %s256_s18 }
  0x2c   : > { %p259_p3 = scmp.lt.s32.totalorder %s257_s19, %s253_s16 }
  0x2e   : > { %p260_p4 = por %p259_p3, %p258_p2 }
  0x30   : > { %p261_p5 = pnand %p260_p4, %p254_p1 }
  0x32   : > { %264 = shalt.err (!%p261_p5)  }
  0x33   : > { %39 = dma.hbm_to_vmem [thread:$0]  %s27_s8, 16, %s37_s29, [#allocation4] }
  0x34   : > { %s41_s22 = scalar_lea.hbm %s451_s2, %s198_s9 }
  0x35   : > { %s265_s23 = scalar_lea.hbm %s41_s22, 16  ;;  %p268_p7 = scmp.lt.u32.totalorder %s41_s22, %s451_s2 }
  0x36   : > { %p266_p6 = scmp.ne.s32.totalorder %s41_s22, %s265_s23  ;;  %p269_p8 = scmp.lt.u32.totalorder %s243_s13, %s265_s23 }
  0x37   : > { %p271_p10 = scmp.lt.u32.totalorder %s265_s23, %s41_s22 }
  0x38   : > { %p270_p9 = por %p269_p8, %p268_p7 }
  0x3a   : > { %p272_p11 = por %p271_p10, %p270_p9 }
  0x3c   : > { %p273_p12 = pnand %p272_p11, %p266_p6 }
  0x3e   : > { %276 = shalt.err (!%p273_p12)  }
  0x3f   : > { %s277_s26 = scalar_lea.vmem %s361_s4, 16  ;;  %s314_s0 = smov [#allocation3]  }
  0x40   : > { %p278_p13 = scmp.ne.s32.totalorder %s361_s4, %s277_s26  ;;  %s279_s1 = sshll.u32 %s314_s0, 4  ;;  %s280_s1 = int_to_ptr.vmem [resolvable:$false] %s279_s1 }
  0x41   : > { %s281_s28 = scalar_lea.vmem %s280_s1, 2048  ;;  %p282_p0 = scmp.lt.s32.totalorder %s361_s4, %s280_s1 }
  0x42   : > { %p283_p1 = scmp.lt.s32.totalorder %s281_s28, %s277_s26 }
  0x44   : > { %p284_p2 = por %p283_p1, %p282_p0 }
  0x46   : > { %p285_p3 = pnand %p284_p2, %p278_p13 }
  0x48   : > { %288 = shalt.err (!%p285_p3)  }
  0x49   : > { %54 = dma.hbm_to_vmem [thread:$0]  %s41_s22, 16, %s361_s4, [#allocation4 + $0x1] }
  0x4a   : > { %s22_s27 = sadd.s32 1, %s305_s27  }
  0x4b   : > { %p19_p4 = scmp.ge.s32.totalorder %s22_s27, 128  }
  0x4c   :  { %s307_s29 = smov (%p19_p4), 0  }
  0x4d   :  { %21 = sbr.rel (!%p19_p4) target bundleno = 23 (0x17), region = 49 }
  0x54 LB: > { %299 = dma.done.wait [#allocation4], 16  ;;  %s309_s29 = sphi %s307_s29, %s60_s29  }
  0x55   : > { %300 = vsyncadd [#allocation4], 4294967280 }
  0x56   : > { %301 = dma.done.wait [#allocation4 + $0x1], 16 }
  0x57   : > { %302 = vsyncadd [#allocation4 + $0x1], 4294967280  ;;  %s60_s29 = sadd.s32 1, %s309_s29  }
  0x58   : > { %p57_p5 = scmp.ge.s32.totalorder %s60_s29, 128  }
  0x59   :  { %v69_v0 = vld [vmem:[#allocation2 + $0x10] sm:$0xff] (%p57_p5)  ;;  %v67_v2 = vld [vmem:[#allocation2] sm:$0xff] (%p57_p5)  ;;  %v70_v5 = vld [vmem:[#allocation2 + $0x18] sm:$0xff] (%p57_p5)  ;;  %vm147_vm0 = vcmask (%p57_p5), 7168  }
  0x5a   :  { %59 = sbr.rel (!%p57_p5) target bundleno = 84 (0x54), region = 60  ;;  %v85_v1 = vld [vmem:[#allocation3 + $0x10] sm:$0xff] (%p57_p5)  ;;  %v83_v4 = vld [vmem:[#allocation3] sm:$0xff] (%p57_p5)  ;;  %v86_v6 = vld [vmem:[#allocation3 + $0x18] sm:$0xff] (%p57_p5) }
  0x5b   :  { %v101_v3 = vmul.f32 (%p57_p5), %v85_v1, %v69_v0  ;;  %v99_v7 = vmul.f32 (%p57_p5), %v83_v4, %v67_v2  ;;  %v68_v8 = vld [vmem:[#allocation2 + $0x8] sm:$0xff] (%p57_p5)  ;;  %v102_v10 = vmul.f32 (%p57_p5), %v86_v6, %v70_v5  ;;  %v71_v14 = vld [vmem:[#allocation2 + $0x20] sm:$0xff] (%p57_p5)  ;;  %v74_v18 = vld [vmem:[#allocation2 + $0x38] sm:$0xff] (%p57_p5) }
  0x5c   :  { %v84_v9 = vld [vmem:[#allocation3 + $0x8] sm:$0xff] (%p57_p5)  ;;  %v87_v15 = vld [vmem:[#allocation3 + $0x20] sm:$0xff] (%p57_p5)  ;;  %v90_v19 = vld [vmem:[#allocation3 + $0x38] sm:$0xff] (%p57_p5) }
  0x5d   :  { %119 = vadd.xlane.f32.xlu1 (%p57_p5), %v101_v3  ;;  %115 = vadd.xlane.f32.xlu0 (%p57_p5), %v99_v7  ;;  %v100_v11 = vmul.f32 (%p57_p5), %v84_v9, %v68_v8  ;;  %v72_v12 = vld [vmem:[#allocation2 + $0x28] sm:$0xff] (%p57_p5)  ;;  %v103_v17 = vmul.f32 (%p57_p5), %v87_v15, %v71_v14  ;;  %v73_v20 = vld [vmem:[#allocation2 + $0x30] sm:$0xff] (%p57_p5)  ;;  %v106_v22 = vmul.f32 (%p57_p5), %v90_v19, %v74_v18  ;;  %v75_v26 = vld [vmem:[#allocation2 + $0x40] sm:$0xff] (%p57_p5) }
  0x5e   :  { %v88_v13 = vld [vmem:[#allocation3 + $0x28] sm:$0xff] (%p57_p5)  ;;  %v89_v21 = vld [vmem:[#allocation3 + $0x30] sm:$0xff] (%p57_p5)  ;;  %v91_v27 = vld [vmem:[#allocation3 + $0x40] sm:$0xff] (%p57_p5) }
  0x5f   :  { %v104_v16 = vmul.f32 (%p57_p5), %v88_v13, %v72_v12  ;;  %v105_v23 = vmul.f32 (%p57_p5), %v89_v21, %v73_v20  ;;  %v76_v24 = vld [vmem:[#allocation2 + $0x48] sm:$0xff] (%p57_p5)  ;;  %v107_v29 = vmul.f32 (%p57_p5), %v91_v27, %v75_v26  ;;  %v78_v30 = vld [vmem:[#allocation2 + $0x58] sm:$0xff] (%p57_p5)  ;;  %v77_v32 = vld [vmem:[#allocation2 + $0x50] sm:$0xff] (%p57_p5) }
  0x60   :  { %v92_v25 = vld [vmem:[#allocation3 + $0x48] sm:$0xff] (%p57_p5)  ;;  %v94_v31 = vld [vmem:[#allocation3 + $0x58] sm:$0xff] (%p57_p5)  ;;  %v93_v33 = vld [vmem:[#allocation3 + $0x50] sm:$0xff] (%p57_p5) }
  0x61   :  { %121 = vadd.xlane.f32.xlu1 %v102_v10  ;;  %117 = vadd.xlane.f32.xlu0 %v100_v11  ;;  %v108_v28 = vmul.f32 %v92_v25, %v76_v24  ;;  %v110_v34 = vmul.f32 %v94_v31, %v78_v30  ;;  %v109_v35 = vmul.f32 %v93_v33, %v77_v32  ;;  %v80_v36 = vld [vmem:[#allocation2 + $0x68] sm:$0xff]  ;;  %v79_v38 = vld [vmem:[#allocation2 + $0x60] sm:$0xff]  ;;  %v82_v42 = vld [vmem:[#allocation2 + $0x78] sm:$0xff] }
  0x62   :  { %v96_v37 = vld [vmem:[#allocation3 + $0x68] sm:$0xff]  ;;  %v95_v39 = vld [vmem:[#allocation3 + $0x60] sm:$0xff]  ;;  %v98_v43 = vld [vmem:[#allocation3 + $0x78] sm:$0xff] }
  0x63   :  { %v112_v40 = vmul.f32 %v96_v37, %v80_v36  ;;  %v111_v41 = vmul.f32 %v95_v39, %v79_v38  ;;  %v81_v44 = vld [vmem:[#allocation2 + $0x70] sm:$0xff]  ;;  %v114_v46 = vmul.f32 %v98_v43, %v82_v42 }
  0x64   :  { %v97_v45 = vld [vmem:[#allocation3 + $0x70] sm:$0xff] }
  0x65   :  { %125 = vadd.xlane.f32.xlu1 %v104_v16  ;;  %123 = vadd.xlane.f32.xlu0 %v103_v17  ;;  %v113_v47 = vmul.f32 %v97_v45, %v81_v44 }
  0x69   :  { %129 = vadd.xlane.f32.xlu1 %v106_v22  ;;  %127 = vadd.xlane.f32.xlu0 %v105_v23 }
  0x6d   :  { %133 = vadd.xlane.f32.xlu1 %v108_v28  ;;  %131 = vadd.xlane.f32.xlu0 %v107_v29 }
  0x71   :  { %137 = vadd.xlane.f32.xlu1 %v110_v34  ;;  %135 = vadd.xlane.f32.xlu0 %v109_v35 }
  0x75   :  { %141 = vadd.xlane.f32.xlu1 %v112_v40  ;;  %139 = vadd.xlane.f32.xlu0 %v111_v41 }
  0x79   :  { %145 = vadd.xlane.f32.xlu1 %v114_v46  ;;  %143 = vadd.xlane.f32.xlu0 %v113_v47 }
  0xea   :  { %v120_v48 = vpop.xlane.xlu1 %119  ;;  %v116_v49 = vpop.xlane.xlu0 %115 }
  0xeb   :  { %150 = vst.msk [vmem:[%s452_s3 + $0x10] sm:$0xff] %vm147_vm0, %v120_v48  ;;  %148 = vst.msk [vmem:[%s452_s3] sm:$0xff] %vm147_vm0, %v116_v49 }
  0xee   :  { %v122_v50 = vpop.xlane.xlu1 %121  ;;  %v118_v51 = vpop.xlane.xlu0 %117 }
  0xef   :  { %151 = vst.msk [vmem:[%s452_s3 + $0x18] sm:$0xff] %vm147_vm0, %v122_v50  ;;  %149 = vst.msk [vmem:[%s452_s3 + $0x8] sm:$0xff] %vm147_vm0, %v118_v51 }
  0xf2   :  { %v126_v52 = vpop.xlane.xlu1 %125  ;;  %v124_v53 = vpop.xlane.xlu0 %123 }
  0xf3   :  { %153 = vst.msk [vmem:[%s452_s3 + $0x28] sm:$0xff] %vm147_vm0, %v126_v52  ;;  %152 = vst.msk [vmem:[%s452_s3 + $0x20] sm:$0xff] %vm147_vm0, %v124_v53 }
  0xf6   :  { %v130_v54 = vpop.xlane.xlu1 %129  ;;  %v128_v55 = vpop.xlane.xlu0 %127 }
  0xf7   :  { %155 = vst.msk [vmem:[%s452_s3 + $0x38] sm:$0xff] %vm147_vm0, %v130_v54  ;;  %154 = vst.msk [vmem:[%s452_s3 + $0x30] sm:$0xff] %vm147_vm0, %v128_v55 }
  0xfa   :  { %v134_v56 = vpop.xlane.xlu1 %133  ;;  %v132_v57 = vpop.xlane.xlu0 %131 }
  0xfb   :  { %157 = vst.msk [vmem:[%s452_s3 + $0x48] sm:$0xff] %vm147_vm0, %v134_v56  ;;  %156 = vst.msk [vmem:[%s452_s3 + $0x40] sm:$0xff] %vm147_vm0, %v132_v57 }
  0xfe   :  { %v138_v58 = vpop.xlane.xlu1 %137  ;;  %v136_v59 = vpop.xlane.xlu0 %135 }
  0xff   :  { %159 = vst.msk [vmem:[%s452_s3 + $0x58] sm:$0xff] %vm147_vm0, %v138_v58  ;;  %158 = vst.msk [vmem:[%s452_s3 + $0x50] sm:$0xff] %vm147_vm0, %v136_v59 }
 0x102   :  { %v142_v60 = vpop.xlane.xlu1 %141  ;;  %v140_v61 = vpop.xlane.xlu0 %139 }
 0x103   :  { %161 = vst.msk [vmem:[%s452_s3 + $0x68] sm:$0xff] %vm147_vm0, %v142_v60  ;;  %160 = vst.msk [vmem:[%s452_s3 + $0x60] sm:$0xff] %vm147_vm0, %v140_v61 }
 0x106   :  { %v146_v62 = vpop.xlane.xlu1 %145  ;;  %v144_v63 = vpop.xlane.xlu0 %143 }
 0x107   :  { %163 = vst.msk [vmem:[%s452_s3 + $0x78] sm:$0xff] %vm147_vm0, %v146_v62  ;;  %162 = vst.msk [vmem:[%s452_s3 + $0x70] sm:$0xff] %vm147_vm0, %v144_v63 }
 0x108   :  { %168 = vsyncmov [#allocation4] }
 0x10b   :  { %s169_s30 = vpop.sfrf %168 }
 0x10c   :  { %p199_p6 = scmp.ne.s32.totalorder %s169_s30, 0 }
 0x10e   :  { %173 = shalt.err (%p199_p6)  }
 0x10f   :  { %175 = vsyncmov [#allocation4 + $0x1] }
 0x112   :  { %s176_s4 = vpop.sfrf %175 }
 0x113   :  { %p200_p7 = scmp.ne.s32.totalorder %s176_s4, 0 }
 0x115   :  { %180 = shalt.err (%p200_p7)  }

</bundles_post_ra>
